<compile_context>
chip_gen: v7x
topology: tpu7x:2x2x1
jax: 0.10.0
libtpu: 0.0.40
codegen_flags: <defaults>
</compile_context>

<pallas_src>
import jax
import jax.numpy as jnp
from jax.experimental import pallas as pl
from jax.experimental.pallas import tpu as pltpu

INPUT_DIM = 100
HIDDEN_DIM = 128
OUTPUT_DIM = 784


def _round_up(x, m):
    return ((x + m - 1) // m) * m


def generator_kernel(z_ref, w1_ref, b1_ref, w2_ref, b2_ref, w3_ref, b3_ref, o_ref):
    # Fused 3-layer MLP. Matmul inputs are bf16 (native MXU rate); accumulation
    # is f32; bias/ReLU/tanh in f32; final store in bf16 (o_ref dtype).
    z = z_ref[...].astype(jnp.bfloat16)                                   # (tile_b, 100)
    h1 = jnp.dot(z, w1_ref[...], preferred_element_type=jnp.float32) + b1_ref[...]
    h1 = jnp.maximum(h1, 0.0).astype(jnp.bfloat16)                        # ReLU -> bf16
    h2 = jnp.dot(h1, w2_ref[...], preferred_element_type=jnp.float32) + b2_ref[...]
    h2 = jnp.maximum(h2, 0.0).astype(jnp.bfloat16)                        # ReLU -> bf16
    out = jnp.dot(h2, w3_ref[...], preferred_element_type=jnp.float32) + b3_ref[...]
    o_ref[...] = jnp.tanh(out).astype(o_ref.dtype)                        # Tanh -> bf16 store
    # TODO(synk): if a v5e bundle dump shows the single EUP binding on the
    # 784-wide tanh, chunk the third matmul+tanh+store over 128-col slices.


def _build_call(tile_b, grid, b_pad):
    def const(shape):
        # Weights/biases: same block every grid step (fully VMEM resident).
        return pl.BlockSpec(shape, lambda i: (0, 0))

    return pl.pallas_call(
        generator_kernel,
        out_shape=jax.ShapeDtypeStruct((b_pad, OUTPUT_DIM), jnp.bfloat16),
        grid_spec=pltpu.PrefetchScalarGridSpec(
            num_scalar_prefetch=0,
            grid=grid,
            in_specs=[
                pl.BlockSpec((tile_b, INPUT_DIM), lambda i: (i, 0)),  # z tile (f32, full last dim)
                const((INPUT_DIM, HIDDEN_DIM)),                       # W1 (bf16)
                const((1, HIDDEN_DIM)),                               # b1 (f32)
                const((HIDDEN_DIM, HIDDEN_DIM)),                      # W2 (bf16)
                const((1, HIDDEN_DIM)),                               # b2 (f32)
                const((HIDDEN_DIM, OUTPUT_DIM)),                      # W3 (bf16)
                const((1, OUTPUT_DIM)),                               # b3 (f32)
            ],
            out_specs=pl.BlockSpec((tile_b, OUTPUT_DIM), lambda i: (i, 0)),
        ),
        compiler_params=pltpu.CompilerParams(
            dimension_semantics=("parallel",),
        ),
    )


def prepare_params(w1, b1, w2, b2, w3, b3):
    """One-time parameter prep: cast weights to bf16, keep biases f32.

    Call once and reuse across forward calls (hoisted out of the hot path)."""
    return (w1.astype(jnp.bfloat16), b1,
            w2.astype(jnp.bfloat16), b2,
            w3.astype(jnp.bfloat16), b3)


def _choose_tiling(B):
    if B <= 128:
        # Single grid step; round to 16 (bf16 sublane packing).
        tile_b = max(16, _round_up(B, 16))
        b_pad = tile_b
    elif B <= 1024:
        # Exactly 2 parallel steps -> both v7x TensorCores busy for mid batches.
        tile_b = _round_up(-(-B // 2), 128)
        b_pad = 2 * tile_b
    else:
        # Large batches: 512-row tiles (step overhead amortized, VMEM-safe
        # everywhere: ~2 MiB of double-buffered activations + ~260 KiB weights).
        tile_b = 512
        b_pad = _round_up(B, tile_b)
    return tile_b, b_pad


def generator_forward(z, w1_bf, b1, w2_bf, b2, w3_bf, b3):
    """z: (B, 100) f32; weights pre-prepared by `prepare_params`. Returns (B, 784) bf16."""
    B, d_in = z.shape
    assert d_in == INPUT_DIM

    tile_b, b_pad = _choose_tiling(B)
    grid = (b_pad // tile_b,)

    z_in = z if b_pad == B else jnp.pad(z, ((0, b_pad - B), (0, 0)))

    out = _build_call(tile_b, grid, b_pad)(z_in, w1_bf, b1, w2_bf, b2, w3_bf, b3)
    return out if b_pad == B else out[:B]


def init_params(key):
    # Deterministic synthetic parameters (PyTorch-Linear-like uniform init), f32.
    ks = jax.random.split(key, 6)

    def linear(kw, kb, fan_in, fan_out):
        bound = 1.0 / jnp.sqrt(fan_in)
        w = jax.random.uniform(kw, (fan_in, fan_out), jnp.float32, -bound, bound)
        b = jax.random.uniform(kb, (1, fan_out), jnp.float32, -bound, bound)
        return w, b

    w1, b1 = linear(ks[0], ks[1], INPUT_DIM, HIDDEN_DIM)
    w2, b2 = linear(ks[2], ks[3], HIDDEN_DIM, HIDDEN_DIM)
    w3, b3 = linear(ks[4], ks[5], HIDDEN_DIM, OUTPUT_DIM)
    return w1, b1, w2, b2, w3, b3


def reference_forward_f32(z, w1, b1, w2, b2, w3, b3):
    h1 = jnp.maximum(z @ w1 + b1, 0.0)
    h2 = jnp.maximum(h1 @ w2 + b2, 0.0)
    return jnp.tanh(h2 @ w3 + b3)


def reference_forward_bf16(z, w1, b1, w2, b2, w3, b3):
    # Mirrors the kernel's precision choices (bf16 matmul inputs, f32 accumulate,
    # bf16 final store).
    bf = jnp.bfloat16
    h1 = jnp.dot(z.astype(bf), w1.astype(bf), preferred_element_type=jnp.float32) + b1
    h1 = jnp.maximum(h1, 0.0).astype(bf)
    h2 = jnp.dot(h1, w2.astype(bf), preferred_element_type=jnp.float32) + b2
    h2 = jnp.maximum(h2, 0.0).astype(bf)
    out = jnp.tanh(jnp.dot(h2, w3.astype(bf), preferred_element_type=jnp.float32) + b3)
    return out.astype(bf).astype(jnp.float32)


if __name__ == "__main__":
    key = jax.random.PRNGKey(0)
    kz, kp = jax.random.split(key)

    B = 16  # small batch: single grid step, no row padding needed
    z = jax.random.normal(kz, (B, INPUT_DIM), dtype=jnp.float32)
    params = init_params(kp)

    prepared = prepare_params(*params)          # one-time weight prep (bf16 cast)
    fwd = jax.jit(lambda zz: generator_forward(zz, *prepared))

    out = jax.block_until_ready(fwd(z))
    assert out.shape == (B, OUTPUT_DIM)
    assert out.dtype == jnp.bfloat16

    out_f32 = out.astype(jnp.float32)

    # Tight check vs. a precision-matched (bf16 matmul / bf16 store) reference.
    ref_bf16 = reference_forward_bf16(z, *params)
    assert jnp.allclose(out_f32, ref_bf16, atol=4e-3, rtol=0), (
        float(jnp.max(jnp.abs(out_f32 - ref_bf16))))

    # Relaxed check vs. the full-f32 reference (bf16 quantization error only).
    ref_f32 = reference_forward_f32(z, *params)
    assert jnp.allclose(out_f32, ref_f32, atol=5e-2, rtol=0), (
        float(jnp.max(jnp.abs(out_f32 - ref_f32))))

    print("KERNEL_OK")
</pallas_src>

<mosaic_0001>
module attributes {stable_mosaic.version = 11 : i64} {
  func.func @generator_kernel(%arg0: i32, %arg1: memref<16x100xf32, #tpu.memory_space<vmem>>, %arg2: memref<100x128xbf16, #tpu.memory_space<vmem>>, %arg3: memref<1x128xf32, #tpu.memory_space<vmem>>, %arg4: memref<128x128xbf16, #tpu.memory_space<vmem>>, %arg5: memref<1x128xf32, #tpu.memory_space<vmem>>, %arg6: memref<128x784xbf16, #tpu.memory_space<vmem>>, %arg7: memref<1x784xf32, #tpu.memory_space<vmem>>, %arg8: memref<16x784xbf16, #tpu.memory_space<vmem>>) attributes {dimension_semantics = [#tpu.dimension_semantics<parallel>], iteration_bounds = array<i64: 1>, scalar_prefetch = 0 : i64, scratch_operands = 0 : i64, tpu.core_type = #tpu.core_type<tc>, window_params = [{transform_indices = @transform_0, window_bounds = array<i64: 16, 100>}, {pipeline_mode = #tpu.pipeline_mode<synchronous>, transform_indices = @transform_1, window_bounds = array<i64: 100, 128>}, {pipeline_mode = #tpu.pipeline_mode<synchronous>, transform_indices = @transform_2, window_bounds = array<i64: 1, 128>}, {pipeline_mode = #tpu.pipeline_mode<synchronous>, transform_indices = @transform_3, window_bounds = array<i64: 128, 128>}, {pipeline_mode = #tpu.pipeline_mode<synchronous>, transform_indices = @transform_4, window_bounds = array<i64: 1, 128>}, {pipeline_mode = #tpu.pipeline_mode<synchronous>, transform_indices = @transform_5, window_bounds = array<i64: 128, 784>}, {pipeline_mode = #tpu.pipeline_mode<synchronous>, transform_indices = @transform_6, window_bounds = array<i64: 1, 784>}, {transform_indices = @transform_7, window_bounds = array<i64: 16, 784>}]} {
    %c0 = arith.constant 0 : index
    %c0_0 = arith.constant 0 : index
    %0 = vector.load %arg1[%c0, %c0_0] : memref<16x100xf32, #tpu.memory_space<vmem>>, vector<16x100xf32>
    %1 = arith.truncf %0 : vector<16x100xf32> to vector<16x100xbf16>
    %c0_1 = arith.constant 0 : index
    %c0_2 = arith.constant 0 : index
    %2 = vector.load %arg2[%c0_1, %c0_2] : memref<100x128xbf16, #tpu.memory_space<vmem>>, vector<100x128xbf16>
    %cst = arith.constant dense<0.000000e+00> : vector<16x128xf32>
    %3 = tpu.matmul %1, %2, %cst {dimension_numbers = #tpu.dot_dimension_numbers<[1], [0], [0], [1], [0, 0, 1, 1], [], []>} : vector<16x100xbf16>, vector<100x128xbf16>, vector<16x128xf32> -> vector<16x128xf32>
    %c0_3 = arith.constant 0 : index
    %c0_4 = arith.constant 0 : index
    %4 = vector.load %arg3[%c0_3, %c0_4] : memref<1x128xf32, #tpu.memory_space<vmem>>, vector<1x128xf32>
    %5 = vector.broadcast %4 : vector<1x128xf32> to vector<16x128xf32>
    %6 = arith.addf %3, %5 : vector<16x128xf32>
    %cst_5 = arith.constant 0.000000e+00 : f32
    %7 = vector.broadcast %cst_5 : f32 to vector<16x128xf32>
    %8 = arith.maximumf %6, %7 : vector<16x128xf32>
    %9 = arith.truncf %8 : vector<16x128xf32> to vector<16x128xbf16>
    %c0_6 = arith.constant 0 : index
    %c0_7 = arith.constant 0 : index
    %10 = vector.load %arg4[%c0_6, %c0_7] : memref<128x128xbf16, #tpu.memory_space<vmem>>, vector<128x128xbf16>
    %cst_8 = arith.constant dense<0.000000e+00> : vector<16x128xf32>
    %11 = tpu.matmul %9, %10, %cst_8 {dimension_numbers = #tpu.dot_dimension_numbers<[1], [0], [0], [1], [0, 0, 1, 1], [], []>} : vector<16x128xbf16>, vector<128x128xbf16>, vector<16x128xf32> -> vector<16x128xf32>
    %c0_9 = arith.constant 0 : index
    %c0_10 = arith.constant 0 : index
    %12 = vector.load %arg5[%c0_9, %c0_10] : memref<1x128xf32, #tpu.memory_space<vmem>>, vector<1x128xf32>
    %13 = vector.broadcast %12 : vector<1x128xf32> to vector<16x128xf32>
    %14 = arith.addf %11, %13 : vector<16x128xf32>
    %cst_11 = arith.constant 0.000000e+00 : f32
    %15 = vector.broadcast %cst_11 : f32 to vector<16x128xf32>
    %16 = arith.maximumf %14, %15 : vector<16x128xf32>
    %17 = arith.truncf %16 : vector<16x128xf32> to vector<16x128xbf16>
    %c0_12 = arith.constant 0 : index
    %c0_13 = arith.constant 0 : index
    %18 = vector.load %arg6[%c0_12, %c0_13] : memref<128x784xbf16, #tpu.memory_space<vmem>>, vector<128x784xbf16>
    %cst_14 = arith.constant dense<0.000000e+00> : vector<16x784xf32>
    %19 = tpu.matmul %17, %18, %cst_14 {dimension_numbers = #tpu.dot_dimension_numbers<[1], [0], [0], [1], [0, 0, 1, 1], [], []>} : vector<16x128xbf16>, vector<128x784xbf16>, vector<16x784xf32> -> vector<16x784xf32>
    %c0_15 = arith.constant 0 : index
    %c0_16 = arith.constant 0 : index
    %20 = vector.load %arg7[%c0_15, %c0_16] : memref<1x784xf32, #tpu.memory_space<vmem>>, vector<1x784xf32>
    %21 = vector.broadcast %20 : vector<1x784xf32> to vector<16x784xf32>
    %22 = arith.addf %19, %21 : vector<16x784xf32>
    %23 = math.tanh %22 : vector<16x784xf32>
    %24 = arith.truncf %23 : vector<16x784xf32> to vector<16x784xbf16>
    %c0_17 = arith.constant 0 : index
    %c0_18 = arith.constant 0 : index
    %25 = vector.load %arg8[%c0_17, %c0_18] : memref<16x784xbf16, #tpu.memory_space<vmem>>, vector<16x784xbf16>
    tpu.vector_store %arg8[%c0_17, %c0_18], %24 {strides = array<i32>} : memref<16x784xbf16, #tpu.memory_space<vmem>>, vector<16x784xbf16>,
    return
  }
  func.func @transform_0(%arg0: i32) -> (i32, i32) {
    %c0_i32 = arith.constant 0 : i32
    %c0_i32_0 = arith.constant 0 : i32
    return %arg0, %c0_i32 : i32, i32
  }
  func.func @transform_1(%arg0: i32) -> (i32, i32) {
    %c0_i32 = arith.constant 0 : i32
    %c0_i32_0 = arith.constant 0 : i32
    %c0_i32_1 = arith.constant 0 : i32
    return %c0_i32, %c0_i32_0 : i32, i32
  }
  func.func @transform_2(%arg0: i32) -> (i32, i32) {
    %c0_i32 = arith.constant 0 : i32
    %c0_i32_0 = arith.constant 0 : i32
    %c0_i32_1 = arith.constant 0 : i32
    return %c0_i32, %c0_i32_0 : i32, i32
  }
  func.func @transform_3(%arg0: i32) -> (i32, i32) {
    %c0_i32 = arith.constant 0 : i32
    %c0_i32_0 = arith.constant 0 : i32
    %c0_i32_1 = arith.constant 0 : i32
    return %c0_i32, %c0_i32_0 : i32, i32
  }
  func.func @transform_4(%arg0: i32) -> (i32, i32) {
    %c0_i32 = arith.constant 0 : i32
    %c0_i32_0 = arith.constant 0 : i32
    %c0_i32_1 = arith.constant 0 : i32
    return %c0_i32, %c0_i32_0 : i32, i32
  }
  func.func @transform_5(%arg0: i32) -> (i32, i32) {
    %c0_i32 = arith.constant 0 : i32
    %c0_i32_0 = arith.constant 0 : i32
    %c0_i32_1 = arith.constant 0 : i32
    return %c0_i32, %c0_i32_0 : i32, i32
  }
  func.func @transform_6(%arg0: i32) -> (i32, i32) {
    %c0_i32 = arith.constant 0 : i32
    %c0_i32_0 = arith.constant 0 : i32
    %c0_i32_1 = arith.constant 0 : i32
    return %c0_i32, %c0_i32_0 : i32, i32
  }
  func.func @transform_7(%arg0: i32) -> (i32, i32) {
    %c0_i32 = arith.constant 0 : i32
    %c0_i32_0 = arith.constant 0 : i32
    return %arg0, %c0_i32 : i32, i32
  }
}

</mosaic_0001>

<bundles_post_ra>
// kernel: _lambda_.1
= control target key start
LH: loop header
LB: loop body
LE: loop exit
PB: predicated region body
PF: predicated region fallthrough
CT: control target
= control target key end

     0   :  { %v1226_v1 = vmov 0.0   ;;  %vm1227_vm0 = vmmov 0   ;;  %vm94_vm1 = vcmask 1041408   ;;  %vm90_vm2 = vcmask 818176   ;;  %s1541_s0 = inlined_call_operand.vmem [shape: f32[16,100], index: 0, kind: input, shape index: {}]   ;;  %s1542_s1 = inlined_call_operand.vmem [shape: bf16[100,128], index: 1, kind: input, shape index: {}]   ;;  %s1543_s2 = inlined_call_operand.vmem [shape: f32[1,128], index: 2, kind: input, shape index: {}]   ;;  %s1544_s3 = inlined_call_operand.vmem [shape: bf16[128,128], index: 3, kind: input, shape index: {}]   ;;  %s1545_s4 = inlined_call_operand.vmem [shape: f32[1,128], index: 4, kind: input, shape index: {}]   ;;  %s1546_s5 = inlined_call_operand.vmem [shape: bf16[128,784], index: 5, kind: input, shape index: {}]   ;;  %s1547_s6 = inlined_call_operand.vmem [shape: f32[1,784], index: 6, kind: input, shape index: {}]   ;;  %s1548_s7 = inlined_call_operand.hbm [shape: bf16[16,784], index: 7, kind: output, shape index: {}]  }
   0x1   :  { %v1079_v0 = vld [vmem:[%s1542_s1] sm:$0xff]   ;;  %1015 = vmatprep.subr.bf16.mxu0 %v1226_v1  ;;  %1033 = vmatprep.subr.bf16.mxu1 %v1226_v1  ;;  %v1080_v2 = vld [vmem:[%s1542_s1 + $0x8] sm:$0xff]   ;;  %v1081_v3 = vld [vmem:[%s1542_s1 + $0x10] sm:$0xff]  }
   0x2   :  { %1016 = vmatpush3.bf16.msra.mxu0 %v1079_v0  ;;  %1029 = vmatprep.mubr.msk.bf16.mxu0 %vm1227_vm0, %v1226_v1  ;;  %v1086_v4 = vld [vmem:[%s1544_s3] sm:$0xff]   ;;  %v1082_v5 = vld [vmem:[%s1542_s1 + $0x18] sm:$0xff]   ;;  %v1087_v6 = vld [vmem:[%s1544_s3 + $0x8] sm:$0xff]  }
   0x3   :  { %1017 = vmatprep.subr.bf16.mxu0 %v1226_v1  ;;  %1049 = vmatprep.mubr.msk.bf16.mxu1 %vm1227_vm0, %v1226_v1  ;;  %v1083_v7 = vld [vmem:[%s1542_s1 + $0x20] sm:$0xff]   ;;  %v1088_v8 = vld [vmem:[%s1544_s3 + $0x10] sm:$0xff]   ;;  %v1084_v9 = vld [vmem:[%s1542_s1 + $0x28] sm:$0xff]  }
   0x4   :  { %1034 = vmatpush3.bf16.msra.mxu1 %v1086_v4  ;;  %v1089_v10 = vld [vmem:[%s1544_s3 + $0x18] sm:$0xff]   ;;  %v1085_v11 = vld [vmem:[%s1542_s1 + $0x30] ss:$0 sps:$4 sm:$0x33]   ;;  %v28_v12 = vld [vmem:[%s1541_s0] sm:$0xff] }
   0x5   :  { %1035 = vmatprep.subr.bf16.mxu1 %v1226_v1  ;;  %v29_v13 = vld [vmem:[%s1541_s0 + $0x8] sm:$0xff]  ;;  %v1090_v14 = vld [vmem:[%s1544_s3 + $0x20] sm:$0xff]   ;;  %v96_v15 = vsel %vm94_vm1, %v1085_v11, 0 }
   0x6   :  { %1018 = vmatpush3.bf16.msra.mxu0 %v1080_v2  ;;  %v1091_v16 = vld [vmem:[%s1544_s3 + $0x28] sm:$0xff]   ;;  %v30_v17 = vpack.c.bf16 %v29_v13, %v28_v12 }
   0x7   :  { %1019 = vmatprep.subr.bf16.mxu0 %v1226_v1 }
   0x8   :  { %1036 = vmatpush3.bf16.msra.mxu1 %v1087_v6 }
   0x9   :  { %1037 = vmatprep.subr.bf16.mxu1 %v1226_v1 }
   0xa   :  { %1020 = vmatpush3.bf16.msra.mxu0 %v1081_v3 }
   0xb   :  { %1021 = vmatprep.subr.bf16.mxu0 %v1226_v1 }
   0xc   :  { %1038 = vmatpush3.bf16.msra.mxu1 %v1088_v8 }
   0xd   :  { %1039 = vmatprep.subr.bf16.mxu1 %v1226_v1 }
   0xe   :  { %1022 = vmatpush3.bf16.msra.mxu0 %v1082_v5 }
   0xf   :  { %1023 = vmatprep.subr.bf16.mxu0 %v1226_v1 }
  0x10   :  { %1040 = vmatpush3.bf16.msra.mxu1 %v1089_v10 }
  0x11   :  { %1041 = vmatprep.subr.bf16.mxu1 %v1226_v1 }
  0x12   :  { %1024 = vmatpush3.bf16.msra.mxu0 %v1083_v7 }
  0x13   :  { %1025 = vmatprep.subr.bf16.mxu0 %v1226_v1 }
  0x14   :  { %1042 = vmatpush3.bf16.msra.mxu1 %v1090_v14 }
  0x15   :  { %1043 = vmatprep.subr.bf16.mxu1 %v1226_v1 }
  0x16   :  { %1026 = vmatpush3.bf16.msra.mxu0 %v1084_v9 }
  0x17   :  { %1027 = vmatprep.subr.bf16.mxu0 %v1226_v1 }
  0x18   :  { %1044 = vmatpush3.bf16.msra.mxu1 %v1091_v16 }
  0x19   :  { %1045 = vmatprep.subr.bf16.mxu1 %v1226_v1 }
  0x1a   :  { %1028 = vmatpush3.bf16.msra.mxu0 %v96_v15 }
  0x1d   :  { %1030 = vmatmul.mubr.msk.bf16.vlgmr.msra.gmra.mrb[0].mxu0 %vm90_vm2, %v30_v17 }
  0x1e   :  { %12 = vsyncpa [#allocation3], 0  ;;  %v1092_v18 = vld [vmem:[%s1544_s3 + $0x30] sm:$0xff]   ;;  %v1093_v19 = vld [vmem:[%s1544_s3 + $0x38] sm:$0xff]   ;;  %v1228_v63 = vmov 0   ;;  %vm877_vm3 = vcmask 125952  }
  0x1f   :  { %1046 = vmatpush3.bf16.msra.mxu1 %v1092_v18  ;;  %v1094_v20 = vld [vmem:[%s1546_s5] ss:$28 sps:$4 sm:$0xff]   ;;  %v1099_v22 = vld [vmem:[%s1546_s5 + $0xc] ss:$28 sps:$4 sm:$0xff]   ;;  %v1100_v24 = vld [vmem:[%s1546_s5 + $0x38] ss:$28 sps:$4 sm:$0xff]   ;;  %678 = vmatprep.mubr.bf16.mxu0 %v1228_v63 }
  0x20   :  { %1047 = vmatprep.subr.bf16.mxu1 %v1226_v1  ;;  %v1096_v21 = vld [vmem:[%s1546_s5 + $0x4] ss:$28 sps:$4 sm:$0xff]   ;;  %v1102_v23 = vld [vmem:[%s1546_s5 + $0x3c] ss:$28 sps:$4 sm:$0xff]   ;;  %v1108_v25 = vld [vmem:[%s1546_s5 + $0x74] ss:$28 sps:$4 sm:$0xff]  }
  0x21   :  { %646 = vmatprep.subr.bf16.mxu0 %v1096_v21  ;;  %v1106_v26 = vld [vmem:[%s1546_s5 + $0x70] ss:$28 sps:$4 sm:$0xff]   ;;  %v1112_v28 = vld [vmem:[%s1546_s5 + $0xa8] ss:$28 sps:$4 sm:$0xff]   ;;  %v1118_v30 = vld [vmem:[%s1546_s5 + $0xe0] ss:$28 sps:$4 sm:$0xff]  }
  0x22   :  { %647 = vmatpush1.bf16.msra.mxu0 %v1094_v20  ;;  %v1114_v27 = vld [vmem:[%s1546_s5 + $0xac] ss:$28 sps:$4 sm:$0xff]   ;;  %v1120_v29 = vld [vmem:[%s1546_s5 + $0xe4] ss:$28 sps:$4 sm:$0xff]   ;;  %v1126_v31 = vld [vmem:[%s1546_s5 + $0x11c] ss:$28 sps:$4 sm:$0xff]  }
  0x23   :  { %1048 = vmatpush3.bf16.msra.mxu1 %v1093_v19  ;;  %648 = vmatprep.subr.bf16.mxu0 %v1102_v23  ;;  %v1124_v32 = vld [vmem:[%s1546_s5 + $0x118] ss:$28 sps:$4 sm:$0xff]   ;;  %v899_v33 = vld [vmem:[%s1543_s2] ss:$0 sm:$0xff]  ;;  %v1097_v42 = vld [vmem:[%s1546_s5 + $0x8] ss:$28 sps:$4 sm:$0xff]  }
  0x24   :  { %689 = vmatprep.subr.bf16.mxu1 %v1099_v22  ;;  %v1105_v44 = vld [vmem:[%s1546_s5 + $0x44] ss:$28 sps:$4 sm:$0xff]   ;;  %v1111_v46 = vld [vmem:[%s1546_s5 + $0x7c] ss:$28 sps:$4 sm:$0xff]   ;;  %v1117_v48 = vld [vmem:[%s1546_s5 + $0xb4] ss:$28 sps:$4 sm:$0xff]  }
  0x25   :  { %v1103_v45 = vld [vmem:[%s1546_s5 + $0x40] ss:$28 sps:$4 sm:$0xff]   ;;  %v1109_v47 = vld [vmem:[%s1546_s5 + $0x78] ss:$28 sps:$4 sm:$0xff]   ;;  %v1115_v49 = vld [vmem:[%s1546_s5 + $0xb0] ss:$28 sps:$4 sm:$0xff]  }
  0x26   :  { %649 = vmatpush1.bf16.msra.mxu0 %v1100_v24  ;;  %v1123_v50 = vld [vmem:[%s1546_s5 + $0xec] ss:$28 sps:$4 sm:$0xff]   ;;  %v1129_v52 = vld [vmem:[%s1546_s5 + $0x124] ss:$28 sps:$4 sm:$0xff]   ;;  %v1132_v54 = vld [vmem:[%s1546_s5 + $0x154] ss:$28 sps:$4 sm:$0xff]  }
  0x27   :  { %650 = vmatprep.subr.bf16.mxu0 %v1108_v25  ;;  %v1121_v51 = vld [vmem:[%s1546_s5 + $0xe8] ss:$28 sps:$4 sm:$0xff]   ;;  %v1127_v53 = vld [vmem:[%s1546_s5 + $0x120] ss:$28 sps:$4 sm:$0xff]   ;;  %v1130_v56 = vld [vmem:[%s1546_s5 + $0x150] ss:$28 sps:$4 sm:$0xff]  }
  0x28   :  { %v1135_v55 = vld [vmem:[%s1546_s5 + $0x15c] ss:$28 sps:$4 sm:$0xff]   ;;  %v1138_v58 = vld [vmem:[%s1546_s5 + $0x18c] ss:$28 sps:$4 sm:$0xff]   ;;  %v1141_v59 = vld [vmem:[%s1546_s5 + $0x194] ss:$28 sps:$4 sm:$0xff]  }
  0x29   :  { %v1133_v57 = vld [vmem:[%s1546_s5 + $0x158] ss:$28 sps:$4 sm:$0xff]   ;;  %v1136_v60 = vld [vmem:[%s1546_s5 + $0x188] ss:$28 sps:$4 sm:$0xff]   ;;  %v1139_v61 = vld [vmem:[%s1546_s5 + $0x190] ss:$28 sps:$4 sm:$0xff]  }
  0x2a   :  { %651 = vmatpush1.bf16.msra.mxu0 %v1106_v26  ;;  %v1144_v62 = vld [vmem:[%s1546_s5 + $0x14] ss:$28 sps:$4 sm:$0xff]   ;;  %v908_v0 = vld [vmem:[%s1545_s4] ss:$0 sm:$0xff]  ;;  %v1148_v13 = vld [vmem:[%s1546_s5 + $0x4c] ss:$28 sps:$4 sm:$0xff]  }
  0x2b   :  { %652 = vmatprep.subr.bf16.mxu0 %v1114_v27  ;;  %v1142_v10 = vld [vmem:[%s1546_s5 + $0x10] ss:$28 sps:$4 sm:$0xff]   ;;  %v1145_v11 = vld [vmem:[%s1546_s5 + $0x18] ss:$28 sps:$4 sm:$0xff]   ;;  %v1146_v14 = vld [vmem:[%s1546_s5 + $0x48] ss:$28 sps:$4 sm:$0xff]  }
  0x2c   :  { %v1149_v15 = vld [vmem:[%s1546_s5 + $0x50] ss:$28 sps:$4 sm:$0xff]   ;;  %v1152_v16 = vld [vmem:[%s1546_s5 + $0x84] ss:$28 sps:$4 sm:$0xff]   ;;  %v1156_v19 = vld [vmem:[%s1546_s5 + $0xbc] ss:$28 sps:$4 sm:$0xff]  }
  0x2d   :  { %v1150_v17 = vld [vmem:[%s1546_s5 + $0x80] ss:$28 sps:$4 sm:$0xff]   ;;  %v1153_v18 = vld [vmem:[%s1546_s5 + $0x88] ss:$28 sps:$4 sm:$0xff]   ;;  %v1154_v20 = vld [vmem:[%s1546_s5 + $0xb8] ss:$28 sps:$4 sm:$0xff]  }
  0x2e   :  { %653 = vmatpush1.bf16.msra.mxu0 %v1112_v28  ;;  %v1157_v21 = vld [vmem:[%s1546_s5 + $0xc0] ss:$28 sps:$4 sm:$0xff]   ;;  %v1160_v22 = vld [vmem:[%s1546_s5 + $0xf4] ss:$28 sps:$4 sm:$0xff]   ;;  %v1164_v25 = vld [vmem:[%s1546_s5 + $0x12c] ss:$28 sps:$4 sm:$0xff]  }
  0x2f   :  { %654 = vmatprep.subr.bf16.mxu0 %v1120_v29  ;;  %v1158_v23 = vld [vmem:[%s1546_s5 + $0xf0] ss:$28 sps:$4 sm:$0xff]   ;;  %v1161_v24 = vld [vmem:[%s1546_s5 + $0xf8] ss:$28 sps:$4 sm:$0xff]   ;;  %v1162_v26 = vld [vmem:[%s1546_s5 + $0x128] ss:$28 sps:$4 sm:$0xff]  }
  0x30   :  { %v1165_v27 = vld [vmem:[%s1546_s5 + $0x130] ss:$28 sps:$4 sm:$0xff]   ;;  %v1168_v28 = vld [vmem:[%s1546_s5 + $0x164] ss:$28 sps:$4 sm:$0xff]  }
  0x31   :  { %v1166_v29 = vld [vmem:[%s1546_s5 + $0x160] ss:$28 sps:$4 sm:$0xff]  }
  0x32   :  { %655 = vmatpush1.bf16.msra.mxu0 %v1118_v30  ;;  %v1169_v30 = vld [vmem:[%s1546_s5 + $0x168] ss:$28 sps:$4 sm:$0xff]  }
  0x33   :  { %656 = vmatprep.subr.bf16.mxu0 %v1126_v31  ;;  %v1172_v31 = vld [vmem:[%s1546_s5 + $0x19c] ss:$28 sps:$4 sm:$0xff]  }
  0x36   :  { %657 = vmatpush1.bf16.msra.mxu0 %v1124_v32  ;;  %v1170_v32 = vld [vmem:[%s1546_s5 + $0x198] ss:$28 sps:$4 sm:$0xff]  }
  0x37   :  { %658 = vmatprep.subr.bf16.mxu0 %v1132_v54 }
  0x3a   :  { %659 = vmatpush1.bf16.msra.mxu0 %v1130_v56 }
  0x3b   :  { %660 = vmatprep.subr.bf16.mxu0 %v1138_v58 }
  0x3e   :  { %661 = vmatpush1.bf16.msra.mxu0 %v1136_v60 }
  0x3f   :  { %732 = vmatprep.subr.bf16.mxu0 %v1144_v62 }
  0xf0   :  { %v132_v34 = vpop.f32.mrb[0].mxu0 }
  0xf1   :  { %v133_v35 = vadd.f32 %v899_v33, %v132_v34  ;;  %v1031_v36 = vpop.f32.mrb[1].mxu0  ;;  %v323_v34 = vlaneseq }
  0xf2   :  { %v135_v37 = vpop.f32.mrb[2].mxu0 }
  0xf3   :  { %v136_v38 = vadd.f32 %v899_v33, %v135_v37  ;;  %v1032_v39 = vpop.f32.mrb[3].mxu0  ;;  %v139_v40 = vmax.f32 %v133_v35, 0.0  ;;  %v1173_v33 = vld [vmem:[%s1546_s5 + $0x1a0] ss:$28 sps:$4 sm:$0xff]   ;;  %v324_v35 = vshrl.u32 %v323_v34, 7  ;;  %s1229_s5 = smov [#allocation2]  }
  0xf5   :  { %v140_v41 = vmax.f32 %v136_v38, 0.0  ;;  %v325_v36 = vsub.s32 0, %v324_v35  ;;  %v333_v37 = vsub.s32 2, %v324_v35  ;;  %v321_v38 = vld [vmem:[%s1547_s6] sm:$0x7f]  ;;  %v329_v39 = vsub.s32 1, %v324_v35 }
  0xf6   :  { %s888_s6 = sshll.u32 %s1229_s5, 4  ;;  %s889_s6 = int_to_ptr.vmem [resolvable:$true] %s888_s6 }
  0xf7   :  { %v141_v43 = vpack.c.bf16 %v140_v41, %v139_v40  ;;  %v337_v40 = vsub.s32 3, %v324_v35  ;;  %v326_v41 = vrot.slane %v321_v38, %v325_v36  ;;  %s1202_s3 = scalar_lea.vmem %s889_s6, 896  ;;  %p1207_p1 = scmp.lt.s32.totalorder %s889_s6, %s889_s6 }
  0xf8   :  { %p1203_p0 = scmp.ne.s32.totalorder %s889_s6, %s1202_s3  ;;  %p1208_p2 = scmp.lt.s32.totalorder %s1202_s3, %s1202_s3 }
  0xf9   :  { %1050 = vmatmul.mubr.bf16.vlgmr.msra.gmra.mrb[0].mxu1 %v141_v43  ;;  %v330_v43 = vrot.slane %v321_v38, %v329_v39 }
  0xfa   :  { %690 = vmatpush1.bf16.msra.mxu1 %v1097_v42  ;;  %721 = vmatprep.mubr.bf16.mxu1 %v1228_v63  ;;  %v334_v42 = vrot.slane %v321_v38, %v333_v37  ;;  %p1209_p3 = por %p1208_p2, %p1207_p1 }
  0xfb   :  { %691 = vmatprep.subr.bf16.mxu1 %v1105_v44  ;;  %v338_v44 = vrot.slane %v321_v38, %v337_v40 }
  0xfc   :  { %p1210_p4 = pnand %p1209_p3, %p1203_p0 }
  0xfe   :  { %692 = vmatpush1.bf16.msra.mxu1 %v1103_v45 }
  0xff   :  { %693 = vmatprep.subr.bf16.mxu1 %v1111_v46 }
 0x102   :  { %694 = vmatpush1.bf16.msra.mxu1 %v1109_v47 }
 0x103   :  { %695 = vmatprep.subr.bf16.mxu1 %v1117_v48 }
 0x106   :  { %696 = vmatpush1.bf16.msra.mxu1 %v1115_v49 }
 0x107   :  { %697 = vmatprep.subr.bf16.mxu1 %v1123_v50 }
 0x10a   :  { %698 = vmatpush1.bf16.msra.mxu1 %v1121_v51 }
 0x10b   :  { %699 = vmatprep.subr.bf16.mxu1 %v1129_v52 }
 0x10e   :  { %700 = vmatpush1.bf16.msra.mxu1 %v1127_v53 }
 0x10f   :  { %701 = vmatprep.subr.bf16.mxu1 %v1135_v55 }
 0x112   :  { %702 = vmatpush1.bf16.msra.mxu1 %v1133_v57 }
 0x113   :  { %703 = vmatprep.subr.bf16.mxu1 %v1141_v59 }
 0x116   :  { %704 = vmatpush1.bf16.msra.mxu1 %v1139_v61 }
 0x117   :  { %1053 = vmatprep.subr.bf16.mxu1 %v1226_v1 }
 0x1cc   :  { %v247_v2 = vpop.f32.mrb[0].mxu1 }
 0x1cd   :  { %v248_v3 = vadd.f32 %v908_v0, %v247_v2  ;;  %v1051_v4 = vpop.f32.mrb[1].mxu1 }
 0x1ce   :  { %v250_v5 = vpop.f32.mrb[2].mxu1 }
 0x1cf   :  { %v251_v6 = vadd.f32 %v908_v0, %v250_v5  ;;  %v1052_v7 = vpop.f32.mrb[3].mxu1  ;;  %v254_v8 = vmax.f32 %v248_v3, 0.0 }
 0x1d1   :  { %v255_v9 = vmax.f32 %v251_v6, 0.0 }
 0x1d3   :  { %v256_v12 = vpack.c.bf16 %v255_v9, %v254_v8  ;;  %v341_v9 = vsub.s32 4, %v324_v35 }
 0x1d5   :  { %679 = vmatmul.mubr.bf16.vlgmr.msra.gmra.mrb[4].mxu0 %v256_v12  ;;  %722 = vmatmul.mubr.bf16.vlgmr.msra.gmra.mrb[4].mxu1 %v256_v12 }
 0x1d6   :  { %733 = vmatpush1.bf16.msra.mxu0 %v1142_v10  ;;  %1054 = vmatpush3.bf16.msra.mxu1 %v1145_v11  ;;  %v349_v10 = vsub.s32 6, %v324_v35  ;;  %v345_v11 = vsub.s32 5, %v324_v35 }
 0x1d7   :  { %734 = vmatprep.subr.bf16.mxu0 %v1148_v13  ;;  %1055 = vmatprep.subr.bf16.mxu1 %v1226_v1 }
 0x1d8   :  { %764 = vmatprep.mubr.bf16.mxu0 %v1228_v63  ;;  %1069 = vmatprep.mubr.msk.bf16.mxu1 %vm1227_vm0, %v1226_v1  ;;  %v350_v13 = vrot.slane %v321_v38, %v349_v10 }
 0x1da   :  { %735 = vmatpush1.bf16.msra.mxu0 %v1146_v14  ;;  %1056 = vmatpush3.bf16.msra.mxu1 %v1149_v15  ;;  %v346_v14 = vrot.slane %v321_v38, %v345_v11 }
 0x1db   :  { %736 = vmatprep.subr.bf16.mxu0 %v1152_v16  ;;  %1057 = vmatprep.subr.bf16.mxu1 %v1226_v1 }
 0x1de   :  { %737 = vmatpush1.bf16.msra.mxu0 %v1150_v17  ;;  %1058 = vmatpush3.bf16.msra.mxu1 %v1153_v18 }
 0x1df   :  { %738 = vmatprep.subr.bf16.mxu0 %v1156_v19  ;;  %1059 = vmatprep.subr.bf16.mxu1 %v1226_v1 }
 0x1e2   :  { %739 = vmatpush1.bf16.msra.mxu0 %v1154_v20  ;;  %1060 = vmatpush3.bf16.msra.mxu1 %v1157_v21 }
 0x1e3   :  { %740 = vmatprep.subr.bf16.mxu0 %v1160_v22  ;;  %1061 = vmatprep.subr.bf16.mxu1 %v1226_v1 }
 0x1e6   :  { %741 = vmatpush1.bf16.msra.mxu0 %v1158_v23  ;;  %1062 = vmatpush3.bf16.msra.mxu1 %v1161_v24 }
 0x1e7   :  { %742 = vmatprep.subr.bf16.mxu0 %v1164_v25  ;;  %1063 = vmatprep.subr.bf16.mxu1 %v1226_v1 }
 0x1ea   :  { %743 = vmatpush1.bf16.msra.mxu0 %v1162_v26  ;;  %1064 = vmatpush3.bf16.msra.mxu1 %v1165_v27 }
 0x1eb   :  { %744 = vmatprep.subr.bf16.mxu0 %v1168_v28  ;;  %1065 = vmatprep.subr.bf16.mxu1 %v1226_v1 }
 0x1ee   :  { %745 = vmatpush1.bf16.msra.mxu0 %v1166_v29  ;;  %1066 = vmatpush3.bf16.msra.mxu1 %v1169_v30 }
 0x1ef   :  { %746 = vmatprep.subr.bf16.mxu0 %v1172_v31  ;;  %1067 = vmatprep.subr.bf16.mxu1 %v1226_v1 }
 0x1f2   :  { %747 = vmatpush1.bf16.msra.mxu0 %v1170_v32  ;;  %1068 = vmatpush3.bf16.msra.mxu1 %v1173_v33 }
 0x1f5   :  { %765 = vmatmul.mubr.bf16.vlgmr.msra.gmra.mrb[8].mxu0 %v256_v12  ;;  %1070 = vmatmul.mubr.bf16.vlgmr.msra.gmra.mrb[8].mxu1 %v256_v12  ;;  %v342_v12 = vrot.slane %v321_v38, %v341_v9 }
 0x2a8   :  { %v680_v45 = vpop.f32.mrb[4].mxu0  ;;  %v723_v1 = vpop.f32.mrb[4].mxu1 }
 0x2a9   :  { %v681_v46 = vadd.f32 %v680_v45, %v326_v41  ;;  %v724_v47 = vadd.f32 %v723_v1, %v334_v42  ;;  %v682_v48 = vpop.f32.mrb[5].mxu0  ;;  %v725_v49 = vpop.f32.mrb[5].mxu1 }
 0x2aa   :  { %v683_v50 = vadd.f32 %v682_v48, %v330_v43  ;;  %v726_v51 = vadd.f32 %v725_v49, %v338_v44  ;;  %v684_v52 = vpop.f32.mrb[6].mxu0  ;;  %v727_v53 = vpop.f32.mrb[6].mxu1 }
 0x2ab   :  { %1174 = vtanh.f32 %v681_v46  ;;  %v685_v54 = vadd.f32 %v684_v52, %v326_v41  ;;  %v686_v55 = vpop.f32.mrb[7].mxu0  ;;  %v729_v56 = vpop.f32.mrb[7].mxu1  ;;  %v728_v57 = vadd.f32 %v727_v53, %v334_v42 }
 0x2ac   :  { %1176 = vtanh.f32 %v724_v47  ;;  %v687_v58 = vadd.f32 %v686_v55, %v330_v43  ;;  %v730_v59 = vadd.f32 %v729_v56, %v338_v44 }
 0x2ad   :  { %1178 = vtanh.f32 %v683_v50 }
 0x2ae   :  { %1180 = vtanh.f32 %v726_v51 }
 0x2af   :  { %1182 = vtanh.f32 %v685_v54 }
 0x2b0   :  { %1184 = vtanh.f32 %v728_v57 }
 0x2b1   :  { %1186 = vtanh.f32 %v687_v58 }
 0x2b2   :  { %1188 = vtanh.f32 %v730_v59 }
 0x2b5   :  { %v1175_v60 = vpop.eup %1174 }
 0x2b6   :  { %v1177_v61 = vpop.eup %1176 }
 0x2b7   :  { %v1179_v62 = vpop.eup %1178 }
 0x2b8   :  { %v1181_v63 = vpop.eup %1180  ;;  %v981_v0 = vpack.c.bf16 %v1179_v62, %v1175_v60 }
 0x2b9   :  { %v1183_v2 = vpop.eup %1182  ;;  %v982_v3 = vpack.c.bf16 %v1181_v63, %v1177_v61 }
 0x2ba   :  { %v1185_v4 = vpop.eup %1184  ;;  %874 = vst [vmem:[#allocation2] sm:$0xff] %v981_v0 }
 0x2bb   :  { %v1187_v5 = vpop.eup %1186  ;;  %875 = vst [vmem:[#allocation2 + $0x8] sm:$0xff] %v982_v3 }
 0x2bc   :  { %v1189_v6 = vpop.eup %1188  ;;  %v985_v7 = vpack.c.bf16 %v1187_v5, %v1183_v2 }
 0x2bd   :  { %v986_v8 = vpack.c.bf16 %v1189_v6, %v1185_v4 }
 0x2be   :  { %879 = vst [vmem:[#allocation2 + $0x1c] sm:$0xff] %v985_v7 }
 0x2bf   :  { %880 = vst [vmem:[#allocation2 + $0x24] sm:$0xff] %v986_v8 }
 0x2c8   :  { %v766_v15 = vpop.f32.mrb[8].mxu0  ;;  %v809_v16 = vpop.f32.mrb[8].mxu1 }
 0x2c9   :  { %v767_v17 = vadd.f32 %v766_v15, %v342_v12  ;;  %v810_v18 = vadd.f32 %v809_v16, %v350_v13  ;;  %v768_v19 = vpop.f32.mrb[9].mxu0  ;;  %v1071_v20 = vpop.f32.mrb[9].mxu1 }
 0x2ca   :  { %v769_v21 = vadd.f32 %v768_v19, %v346_v14  ;;  %v770_v22 = vpop.f32.mrb[10].mxu0  ;;  %v812_v23 = vpop.f32.mrb[10].mxu1 }
 0x2cb   :  { %1190 = vtanh.f32 %v767_v17  ;;  %v771_v24 = vadd.f32 %v770_v22, %v342_v12  ;;  %v813_v25 = vadd.f32 %v812_v23, %v350_v13  ;;  %v772_v26 = vpop.f32.mrb[11].mxu0  ;;  %v1072_v27 = vpop.f32.mrb[11].mxu1 }
 0x2cc   :  { %1192 = vtanh.f32 %v810_v18  ;;  %v773_v28 = vadd.f32 %v772_v26, %v346_v14 }
 0x2cd   :  { %1194 = vtanh.f32 %v769_v21 }
 0x2ce   :  { %1196 = vtanh.f32 %v771_v24 }
 0x2cf   :  { %1198 = vtanh.f32 %v813_v25 }
 0x2d0   :  { %1200 = vtanh.f32 %v773_v28 }
 0x2d5   :  { %v1191_v29 = vpop.eup %1190 }
 0x2d6   :  { %v1193_v30 = vpop.eup %1192 }
 0x2d7   :  { %v1195_v31 = vpop.eup %1194  ;;  %v984_v32 = vpack.c.bf16 %v1193_v30, %v1193_v30 }
 0x2d8   :  { %v1197_v33 = vpop.eup %1196  ;;  %v983_v34 = vpack.c.bf16 %v1195_v31, %v1191_v29 }
 0x2d9   :  { %v1199_v35 = vpop.eup %1198  ;;  %878 = vst.msk [vmem:[#allocation2 + $0x18] sm:$0xf] %vm877_vm3, %v984_v32 }
 0x2da   :  { %v1201_v36 = vpop.eup %1200  ;;  %876 = vst [vmem:[#allocation2 + $0x10] sm:$0xff] %v983_v34  ;;  %v988_v37 = vpack.c.bf16 %v1199_v35, %v1199_v35 }
 0x2db   :  { %v987_v38 = vpack.c.bf16 %v1201_v36, %v1197_v33 }
 0x2dc   :  { %882 = vst.msk [vmem:[#allocation2 + $0x34] sm:$0xf] %vm877_vm3, %v988_v37 }
 0x2dd   :  { %881 = vst [vmem:[#allocation2 + $0x2c] sm:$0xff] %v987_v38 }
 0x2de   :  { %1213 = shalt.err (!%p1210_p4)
}
 0x2df   :  { %s1214_s20 = scalar_lea.hbm %s1548_s7, 896 }
 0x2e0   :  { %p1215_p5 = scmp.ne.s32.totalorder %s1548_s7, %s1214_s20  ;;  %p1218_p6 = scmp.lt.u32.totalorder %s1214_s20, %s1548_s7 }
 0x2e2   :  { %p1220_p7 = pnand %p1218_p6, %p1215_p5 }
 0x2e4   :  { %1223 = shalt.err (!%p1220_p7)
}
 0x2e5   :  { %s1230_s25 = smov 448   ;;  %s1231_s26 = smov 28  }
 0x2e6   :  { %894 = dma.vmem_to_hbm [thread:$0]  %s889_s6, 896, %s1548_s7, [#allocation3], %s1230_s25, %s1230_s25, %s1231_s26  }
 0x2e7   :  { %1224 = dma.done.wait [#allocation3], 896  }
 0x2e8   :  { %1225 = vsyncadd [#allocation3], 4294966400 }
 0x2e9   :  { %898 = vsyncpa [#allocation3], 1 }

</bundles_post_ra>
